<compile_context>
chip_gen: v5e
topology: v5e:2x2
jax: 0.10.0
libtpu: 0.0.40
codegen_flags: <defaults>
</compile_context>

<pallas_src>
import jax
import jax.numpy as jnp
from jax.experimental import pallas as pl
from jax.experimental.pallas import tpu as pltpu

_LANE = 128
_SUBLANE = 8
_TB_MAX = 512                        # max batch-tile rows (multiple of 8)
_PER_BUF_BYTES = 8 * 1024 * 1024     # per pipelined input buffer (x2 double-buffered)
_VMEM_LIMIT_CAP = 48 * 1024 * 1024   # stays inside v7x's 64 MiB physical VMEM
_SMALL_FAST_PATH_ELEMS = 128 * 1024  # below this, plain XLA reduce is faster


def _round_up(x: int, m: int) -> int:
    return ((x + m - 1) // m) * m


def _cdiv(a: int, b: int) -> int:
    return -(-a // b)


def _min_identity_scalar(dtype):
    dtype = jnp.dtype(dtype)
    if jnp.issubdtype(dtype, jnp.floating):
        return float("inf")
    if jnp.issubdtype(dtype, jnp.integer):
        return int(jnp.iinfo(dtype).max)
    raise TypeError(f"unsupported dtype for min reduction: {dtype}")


def _running_min(get_chunk, num_chunks: int, n_par: int):
    """Elementwise (VPU) min over `num_chunks` (tb, 128) chunks using `n_par`
    independent partial accumulators (breaks the serial dependency chain)."""
    n_par = max(1, min(n_par, num_chunks))
    parts = [get_chunk(j) for j in range(n_par)]
    for j in range(n_par, num_chunks):
        p = j % n_par
        parts[p] = jnp.minimum(parts[p], get_chunk(j))
    m = parts[0]
    for p in range(1, n_par):
        m = jnp.minimum(m, parts[p])
    return m


def _make_single_block_kernel(feats: int, n_par: int):
    """kernel(x_ref(tb, feats), o_ref(1, 1, tb)) — whole feature axis resident."""
    nfull = feats // _LANE
    rem = feats - nfull * _LANE

    def kernel(x_ref, o_ref):
        if nfull == 0:
            row_min = jnp.min(x_ref[...], axis=-1)
        else:
            starts = [j * _LANE for j in range(nfull)]
            if rem:
                # Overlapping lane-wide tail chunk: min is idempotent, so
                # re-reading columns [feats-128, feats) is exact and avoids
                # any masking or a second cross-lane reduce.
                starts.append(feats - _LANE)
            m = _running_min(lambda j: x_ref[:, starts[j]:starts[j] + _LANE],
                             len(starts), n_par)
            row_min = jnp.min(m, axis=-1)                     # single XLU reduce
        o_ref[...] = row_min.reshape(o_ref.shape).astype(o_ref.dtype)

    return kernel


def _make_multi_block_kernel(feats: int, tf: int, nk: int, identity, n_par: int):
    """kernel(x_ref(tb, tf), o_ref(1, 1, tb), acc_ref(tb, 128)) over a (nb, nk) grid."""
    num_chunks = tf // _LANE
    # First chunk index that can spill past `feats` in the LAST feature block.
    first_masked = (feats - (nk - 1) * tf) // _LANE

    def kernel(x_ref, o_ref, acc_ref):
        k = pl.program_id(1)

        @pl.when(k == 0)
        def _init():
            acc_ref[...] = jnp.full(acc_ref.shape, identity, acc_ref.dtype)

        tb = acc_ref.shape[0]
        if first_masked < num_chunks:
            lane_idx = jax.lax.broadcasted_iota(jnp.int32, (tb, _LANE), 1)
            col0 = k * tf                                     # scalar column offset

        def get_chunk(j):
            c = x_ref[:, j * _LANE:(j + 1) * _LANE]
            if j >= first_masked:
                # Only the last feature block is ragged; mask its
                # out-of-range lanes (unspecified data) to the min identity.
                valid = (lane_idx + (col0 + j * _LANE)) < feats
                c = jnp.where(valid, c, jnp.full_like(c, identity))
            return c

        m = _running_min(get_chunk, num_chunks, n_par)
        acc_ref[...] = jnp.minimum(acc_ref[...], m)

        @pl.when(k == nk - 1)
        def _finish():
            row_min = jnp.min(acc_ref[...], axis=-1)          # single XLU reduce
            o_ref[...] = row_min.reshape(o_ref.shape).astype(o_ref.dtype)

    return kernel


def min_layer_forward(x: jax.Array, *, force_pallas: bool = False) -> jax.Array:
    """Pallas implementation of MinLayer.forward: min over dim=1, keepdim=True."""
    if x.ndim != 2:
        # TODO(synk): Pallas path covers the 2-D (batch, features) layout the
        # module implies; other ranks fall back to the XLA reduce.
        return jnp.min(x, axis=1, keepdims=True)

    batch, feats = x.shape
    if batch == 0 or feats == 0:
        return jnp.min(x, axis=1, keepdims=True)
    if not force_pallas and batch * feats <= _SMALL_FAST_PATH_ELEMS:
        return jnp.min(x, axis=1, keepdims=True)

    itemsize = jnp.dtype(x.dtype).itemsize
    identity = _min_identity_scalar(x.dtype)

    # ---- tile selection (no wrapper-side padding) --------------------------
    if batch <= _SUBLANE:
        tb = batch                                           # full-extent rows
    else:
        # >= 2 batch tiles whenever possible so v7x's two TensorCores both get
        # work on the "parallel" axis; rows stay sublane (8) aligned.
        tb = min(_TB_MAX, _round_up(batch, _SUBLANE),
                 _round_up(_cdiv(batch, 2), _SUBLANE))
    nb = _cdiv(batch, tb)

    row_bytes = tb * itemsize
    if feats * row_bytes <= _PER_BUF_BYTES:
        tf, nk = feats, 1                                    # whole feature axis / block
    else:
        tf = max(_LANE, (_PER_BUF_BYTES // (row_bytes * _LANE)) * _LANE)
        nk = _cdiv(feats, tf)

    n_par = max(1, min(4, 256 // max(tb, 1)))                # independent VPU min chains

    out_shape = jax.ShapeDtypeStruct((nb, 1, tb), x.dtype)
    cost = pl.CostEstimate(flops=batch * feats, transcendentals=0,
                           bytes_accessed=int(x.size * itemsize + nb * tb * itemsize))

    vmem_needed = 2 * tb * tf * itemsize + 2 * tb * itemsize
    if nk > 1:
        vmem_needed += tb * _LANE * itemsize
    vmem_limit = min(max(vmem_needed + (4 << 20), 16 << 20), _VMEM_LIMIT_CAP)

    if nk == 1:
        out = pl.pallas_call(
            _make_single_block_kernel(feats, n_par),
            out_shape=out_shape,
            grid=(nb,),
            in_specs=[pl.BlockSpec((tb, tf), lambda i: (i, 0))],
            out_specs=pl.BlockSpec((1, 1, tb), lambda i: (i, 0, 0)),
            compiler_params=pltpu.CompilerParams(
                dimension_semantics=("parallel",),
                vmem_limit_bytes=vmem_limit),
            cost_estimate=cost,
        )(x)
    else:
        out = pl.pallas_call(
            _make_multi_block_kernel(feats, tf, nk, identity, n_par),
            out_shape=out_shape,
            grid=(nb, nk),
            in_specs=[pl.BlockSpec((tb, tf), lambda i, k: (i, k))],
            out_specs=pl.BlockSpec((1, 1, tb), lambda i, k: (i, 0, 0)),
            scratch_shapes=[pltpu.VMEM((tb, _LANE), x.dtype)],
            compiler_params=pltpu.CompilerParams(
                dimension_semantics=("parallel", "arbitrary"),
                vmem_limit_bytes=vmem_limit),
            cost_estimate=cost,
        )(x)

    # (nb, 1, tb) -> flat -> drop ragged batch tail -> (batch, 1)
    return out.reshape(nb * tb)[:batch].reshape(batch, 1)


class MinLayerParams:
    """Mirrors MinLayer.__init__ (weight/bias declared but unused by forward)."""

    def __init__(self, in_features: int, out_features: int, key: jax.Array):
        kw, _ = jax.random.split(key)
        self.weight = jax.random.normal(kw, (in_features, out_features), jnp.float32)
        self.bias = jnp.zeros((out_features,), jnp.float32)

    def __call__(self, x: jax.Array, **kwargs) -> jax.Array:
        return min_layer_forward(x, **kwargs)


if __name__ == "__main__":
    key = jax.random.PRNGKey(0)
    k_param, k_small, k_mid, k_big = jax.random.split(key, 4)

    in_features, out_features = 32, 8
    layer = MinLayerParams(in_features, out_features, k_param)

    # 1) Small shape consistent with the module; force the Pallas path so the
    #    kernel itself is exercised (auto path would use the XLA fast path).
    x_small = jax.random.normal(k_small, (2, in_features), jnp.float32)
    out_small = jax.block_until_ready(layer(x_small, force_pallas=True))
    ref_small = jnp.min(x_small, axis=1, keepdims=True)
    assert out_small.shape == (2, 1), out_small.shape
    assert jnp.array_equal(out_small, ref_small), (out_small, ref_small)

    # 2) Ragged batch (1030 rows, tb=512 -> 3 tiles) + single-block features
    #    (640 cols, no padding pass): exercises OOB batch rows + lane-dense out.
    x_mid = jax.random.normal(k_mid, (1030, 640), jnp.float32)
    out_mid = jax.block_until_ready(min_layer_forward(x_mid))
    ref_mid = jnp.min(x_mid, axis=1, keepdims=True)
    assert out_mid.shape == (1030, 1), out_mid.shape
    assert jnp.array_equal(out_mid, ref_mid)

    # 3) Multi-block feature reduction with a ragged tail (16500 = 16384 + 116)
    #    -> accumulator scratch + in-kernel lane masking of the last block.
    x_big = jax.random.normal(k_big, (256, 16500), jnp.float32)
    out_big = jax.block_until_ready(min_layer_forward(x_big))
    ref_big = jnp.min(x_big, axis=1, keepdims=True)
    assert out_big.shape == (256, 1), out_big.shape
    assert jnp.array_equal(out_big, ref_big)

    # 4) Auto small-input fast path also matches.
    out_auto = jax.block_until_ready(layer(x_small))
    assert jnp.array_equal(out_auto, ref_small)

    print("KERNEL_OK")
</pallas_src>

<mosaic_0001>
module attributes {stable_mosaic.version = 11 : i64} {
  func.func @kernel(%arg0: i32, %arg1: memref<2x32xf32, #tpu.memory_space<vmem>>, %arg2: memref<1x1x2xf32, #tpu.memory_space<vmem>>) attributes {dimension_semantics = [#tpu.dimension_semantics<parallel>], iteration_bounds = array<i64: 1>, scalar_prefetch = 0 : i64, scratch_operands = 0 : i64, tpu.core_type = #tpu.core_type<tc>, window_params = [{transform_indices = @transform_0, window_bounds = array<i64: 2, 32>}, {transform_indices = @transform_1, window_bounds = array<i64: 1, 1, 2>}]} {
    %c0 = arith.constant 0 : index
    %c0_0 = arith.constant 0 : index
    %0 = vector.load %arg1[%c0, %c0_0] : memref<2x32xf32, #tpu.memory_space<vmem>>, vector<2x32xf32>
    %cst = arith.constant dense<0x7F800000> : vector<2xf32>
    %1 = vector.multi_reduction <minimumf>, %0, %cst [1] : vector<2x32xf32> to vector<2xf32>
    %2 = vector.shape_cast %1 : vector<2xf32> to vector<1x1x2xf32>
    %c0_1 = arith.constant 0 : index
    %c0_2 = arith.constant 0 : index
    %c0_3 = arith.constant 0 : index
    %3 = vector.load %arg2[%c0_1, %c0_2, %c0_3] : memref<1x1x2xf32, #tpu.memory_space<vmem>>, vector<1x1x2xf32>
    tpu.vector_store %arg2[%c0_1, %c0_2, %c0_3], %2 {strides = array<i32>} : memref<1x1x2xf32, #tpu.memory_space<vmem>>, vector<1x1x2xf32>,
    return
  }
  func.func @transform_0(%arg0: i32) -> (i32, i32) {
    %c0_i32 = arith.constant 0 : i32
    %c0_i32_0 = arith.constant 0 : i32
    return %arg0, %c0_i32 : i32, i32
  }
  func.func @transform_1(%arg0: i32) -> (i32, i32, i32) {
    %c0_i32 = arith.constant 0 : i32
    %c0_i32_0 = arith.constant 0 : i32
    %c0_i32_1 = arith.constant 0 : i32
    return %arg0, %c0_i32, %c0_i32_0 : i32, i32, i32
  }
}

</mosaic_0001>

<bundles_post_ra>
// kernel: tpu_custom_call.1
= control target key start
LH: loop header
LB: loop body
LE: loop exit
PB: predicated region body
PF: predicated region fallthrough
CT: control target
= control target key end

     0   :  { %6 = vsyncpa [#allocation3], 0  ;;  %s124_s0 = inlined_call_operand.hbm [shape: f32[2,32], index: 0, kind: input, shape index: {}]   ;;  %s125_s1 = inlined_call_operand.hbm [shape: f32[1,1,2], index: 1, kind: output, shape index: {}]  }
   0x1   :  { %7 = vsyncpa [#allocation4], 0  ;;  %s13_s8 = sshll.u32 %s124_s0, 4  ;;  %s106_s9 = smov [#allocation2]   ;;  %s14_s8 = int_to_ptr.hbm [resolvable:$true] %s13_s8 }
   0x2   :  { %s15_s10 = sshll.u32 %s106_s9, 4  ;;  %s16_s10 = int_to_ptr.vmem [resolvable:$true] %s15_s10 }
   0x3   :  { %18 = dma.hbm_to_vmem [thread:$0]  %s14_s8, 32, %s16_s10, [#allocation3]  }
   0x4   :  { %102 = dma.done.wait [#allocation3], 32  }
   0x5   :  { %103 = vsyncadd [#allocation3], 4294967264  ;;  %vm24_vm0 = vcmask 254976   ;;  %v23_v0 = vld [vmem:[#allocation2] sm:$0x3]  ;;  %v29_v2 = vlaneseq  ;;  %s107_s11 = smov [#allocation5]  }
   0x6   :  { %v25_v1 = vsel %vm24_vm0, %v23_v0, inf  ;;  %s40_s12 = sshll.u32 %s107_s11, 4  ;;  %s42_s15 = sshll.u32 %s125_s1, 4  ;;  %vm33_vm1 = vcmask 8192   ;;  %s41_s12 = int_to_ptr.vmem [resolvable:$true] %s40_s12  ;;  %s43_s15 = int_to_ptr.hbm [resolvable:$true] %s42_s15 }
   0x7   :  { %26 = vmin.xlane.f32.xlu0 %v25_v1  ;;  %v30_v3 = vand.u32 127, %v29_v2 }
  0x7a   :  { %v27_v4 = vpop.xlane.xlu0 %26 }
  0x7b   :  { %v31_v5 = vperm.slane %v27_v4, %v30_v3 }
  0x7d   :  { %34 = vst.msk [vmem:[#allocation5] sm:$0x1] %vm33_vm1, %v31_v5 }
  0x7e   :  { %45 = dma.vmem_to_hbm [thread:$0]  %s41_s12, 16, %s43_s15, [#allocation4]  }
  0x7f   :  { %104 = dma.done.wait [#allocation4], 16  }
  0x80   :  { %105 = vsyncadd [#allocation4], 4294967280 }
  0x81   :  { %50 = vsyncpa [#allocation3], 1 }
  0x82   :  { %51 = vsyncpa [#allocation4], 1 }

</bundles_post_ra>
